<compile_context>
chip_gen: v6e
topology: v6e:2x2x1
jax: 0.10.0
libtpu: 0.0.40
codegen_flags: <defaults>
</compile_context>

<pallas_src>
import jax
import jax.numpy as jnp
from jax.experimental import pallas as pl
from jax.experimental.pallas import tpu as pltpu

BN_EPS = 1e-5


def _bn_relu_fused(h, gamma, beta):
    """BatchNorm1d (training mode, biased variance) + ReLU, fused.

    One statistics pass (sum and sum-of-squares are independent reductions),
    then scale/shift are folded so the per-element epilogue is a single
    FMA + max.  mild E[x^2]-E[x]^2 cancellation risk is fine at these
    magnitudes (checked against the two-pass reference below).
    """
    inv_b = 1.0 / h.shape[0]
    s = jnp.sum(h, axis=0, keepdims=True)
    ssq = jnp.sum(h * h, axis=0, keepdims=True)
    mu = s * inv_b
    var = ssq * inv_b - mu * mu
    scale = gamma * jax.lax.rsqrt(var + BN_EPS)   # EUP
    shift = beta - mu * scale
    return jnp.maximum(h * scale + shift, 0.0)    # one FMA + max per element


def complex_nn_kernel(
    x_ref,
    w1_ref, b1_ref, g1_ref, be1_ref,
    w2_ref, b2_ref, g2_ref, be2_ref,
    w3_ref, b3_ref, g3_ref, be3_ref,
    w4_ref, b4_ref, g4_ref, be4_ref,
    w5_ref, b5_ref,
    o_ref,
):
    x = x_ref[...]                                     # (B, 1)

    # layer1 (Linear 1->64): K=1 contraction is an outer product -> keep it
    # on the VPU as a broadcast FMA, no MXU push/pop.
    h = x * w1_ref[...] + b1_ref[...]                  # (B,1)*(1,64) -> (B,64)
    h = _bn_relu_fused(h, g1_ref[...], be1_ref[...])

    # layer2 (64->128) + bn2 + relu   (dropout p=0.0 is identity)
    h = jnp.dot(h, w2_ref[...], preferred_element_type=jnp.float32) + b2_ref[...]
    h = _bn_relu_fused(h, g2_ref[...], be2_ref[...])

    # layer3 (128->64) + bn3 + relu
    h = jnp.dot(h, w3_ref[...], preferred_element_type=jnp.float32) + b3_ref[...]
    h = _bn_relu_fused(h, g3_ref[...], be3_ref[...])

    # layer4 (64->32) + bn4 + relu
    h = jnp.dot(h, w4_ref[...], preferred_element_type=jnp.float32) + b4_ref[...]
    h = _bn_relu_fused(h, g4_ref[...], be4_ref[...])

    # layer5 (32->1): N=1 matmul replaced by VPU multiply + lane-axis sum (XLU).
    hw = h * w5_ref[...]                               # (B,32)*(1,32)
    o_ref[...] = jnp.sum(hw, axis=-1, keepdims=True) + b5_ref[...]


def complex_nn_forward(x, params):
    """x: (B, 1) float32.  params: dict of pre-transposed weights/biases."""
    B = x.shape[0]
    w5_row = params["w5"].reshape(1, -1)   # (32,1) -> (1,32) for the VPU path
    args = (
        x,
        params["w1"], params["b1"], params["g1"], params["be1"],
        params["w2"], params["b2"], params["g2"], params["be2"],
        params["w3"], params["b3"], params["g3"], params["be3"],
        params["w4"], params["b4"], params["g4"], params["be4"],
        w5_row, params["b5"],
    )
    vmem_spec = pl.BlockSpec(memory_space=pltpu.MemorySpace.VMEM)
    # Total footprint (weights + full-batch activations) is <100 KB at B=64,
    # so no grid / batch tiling is needed; everything lives in VMEM.
    return pl.pallas_call(
        complex_nn_kernel,
        out_shape=jax.ShapeDtypeStruct((B, 1), jnp.float32),
        in_specs=[vmem_spec] * len(args),
        out_specs=vmem_spec,
    )(*args)


def init_params(key):
    """Deterministic init mirroring PyTorch shapes.

    Linear weights stored transposed: (in, out). BN gamma=1, beta=0
    (PyTorch default init).
    """
    dims = [(1, 64), (64, 128), (128, 64), (64, 32), (32, 1)]
    params = {}
    keys = jax.random.split(key, 2 * len(dims))
    for i, (fan_in, fan_out) in enumerate(dims, start=1):
        bound = 1.0 / (fan_in ** 0.5)
        wkey, bkey = keys[2 * (i - 1)], keys[2 * (i - 1) + 1]
        params[f"w{i}"] = jax.random.uniform(
            wkey, (fan_in, fan_out), jnp.float32, -bound, bound
        )
        params[f"b{i}"] = jax.random.uniform(
            bkey, (1, fan_out), jnp.float32, -bound, bound
        )
        if i <= 4:  # BatchNorm layers only on layers 1-4
            params[f"g{i}"] = jnp.ones((1, fan_out), jnp.float32)
            params[f"be{i}"] = jnp.zeros((1, fan_out), jnp.float32)
    return params


def reference_forward(x, params):
    """Pure-JAX reference (two-pass BN, plain matmuls) for correctness check."""
    h = x
    for i in range(1, 5):
        h = h @ params[f"w{i}"] + params[f"b{i}"]
        mu = jnp.mean(h, axis=0, keepdims=True)
        var = jnp.mean((h - mu) ** 2, axis=0, keepdims=True)
        h = (h - mu) / jnp.sqrt(var + BN_EPS)
        h = jnp.maximum(h * params[f"g{i}"] + params[f"be{i}"], 0.0)
    return h @ params["w5"] + params["b5"]


if __name__ == "__main__":
    key = jax.random.PRNGKey(0)
    pkey, xkey = jax.random.split(key)
    params = init_params(pkey)

    B = 64
    # Input like the app's x = linspace(-2pi, 2pi, ...), shaped (B, 1).
    x = jnp.linspace(-2.0 * jnp.pi, 2.0 * jnp.pi, B, dtype=jnp.float32).reshape(B, 1)

    out = complex_nn_forward(x, params)
    out = jax.block_until_ready(out)

    ref = reference_forward(x, params)
    assert out.shape == (B, 1)
    assert jnp.allclose(out, ref, atol=1e-4, rtol=1e-4), "mismatch vs reference"

    print("KERNEL_OK")
</pallas_src>

<mosaic_0001>
module attributes {stable_mosaic.version = 11 : i64} {
  func.func @complex_nn_kernel(%arg0: memref<64x1xf32, #tpu.memory_space<vmem>>, %arg1: memref<1x64xf32, #tpu.memory_space<vmem>>, %arg2: memref<1x64xf32, #tpu.memory_space<vmem>>, %arg3: memref<1x64xf32, #tpu.memory_space<vmem>>, %arg4: memref<1x64xf32, #tpu.memory_space<vmem>>, %arg5: memref<64x128xf32, #tpu.memory_space<vmem>>, %arg6: memref<1x128xf32, #tpu.memory_space<vmem>>, %arg7: memref<1x128xf32, #tpu.memory_space<vmem>>, %arg8: memref<1x128xf32, #tpu.memory_space<vmem>>, %arg9: memref<128x64xf32, #tpu.memory_space<vmem>>, %arg10: memref<1x64xf32, #tpu.memory_space<vmem>>, %arg11: memref<1x64xf32, #tpu.memory_space<vmem>>, %arg12: memref<1x64xf32, #tpu.memory_space<vmem>>, %arg13: memref<64x32xf32, #tpu.memory_space<vmem>>, %arg14: memref<1x32xf32, #tpu.memory_space<vmem>>, %arg15: memref<1x32xf32, #tpu.memory_space<vmem>>, %arg16: memref<1x32xf32, #tpu.memory_space<vmem>>, %arg17: memref<1x32xf32, #tpu.memory_space<vmem>>, %arg18: memref<1x1xf32, #tpu.memory_space<vmem>>, %arg19: memref<64x1xf32, #tpu.memory_space<vmem>>) attributes {dimension_semantics = [], scalar_prefetch = 0 : i64, scratch_operands = 0 : i64, tpu.core_type = #tpu.core_type<tc>} {
    %c0 = arith.constant 0 : index
    %c0_0 = arith.constant 0 : index
    %0 = vector.load %arg0[%c0, %c0_0] : memref<64x1xf32, #tpu.memory_space<vmem>>, vector<64x1xf32>
    %c0_1 = arith.constant 0 : index
    %c0_2 = arith.constant 0 : index
    %1 = vector.load %arg1[%c0_1, %c0_2] : memref<1x64xf32, #tpu.memory_space<vmem>>, vector<1x64xf32>
    %2 = vector.broadcast %0 : vector<64x1xf32> to vector<64x64xf32>
    %3 = vector.broadcast %1 : vector<1x64xf32> to vector<64x64xf32>
    %4 = arith.mulf %2, %3 : vector<64x64xf32>
    %c0_3 = arith.constant 0 : index
    %c0_4 = arith.constant 0 : index
    %5 = vector.load %arg2[%c0_3, %c0_4] : memref<1x64xf32, #tpu.memory_space<vmem>>, vector<1x64xf32>
    %6 = vector.broadcast %5 : vector<1x64xf32> to vector<64x64xf32>
    %7 = arith.addf %4, %6 : vector<64x64xf32>
    %c0_5 = arith.constant 0 : index
    %c0_6 = arith.constant 0 : index
    %8 = vector.load %arg3[%c0_5, %c0_6] : memref<1x64xf32, #tpu.memory_space<vmem>>, vector<1x64xf32>
    %c0_7 = arith.constant 0 : index
    %c0_8 = arith.constant 0 : index
    %9 = vector.load %arg4[%c0_7, %c0_8] : memref<1x64xf32, #tpu.memory_space<vmem>>, vector<1x64xf32>
    %cst = arith.constant dense<0.000000e+00> : vector<64xf32>
    %10 = vector.multi_reduction <add>, %7, %cst [0] : vector<64x64xf32> to vector<64xf32>
    %11 = vector.shape_cast %10 : vector<64xf32> to vector<1x64xf32>
    %12 = arith.mulf %7, %7 : vector<64x64xf32>
    %cst_9 = arith.constant dense<0.000000e+00> : vector<64xf32>
    %13 = vector.multi_reduction <add>, %12, %cst_9 [0] : vector<64x64xf32> to vector<64xf32>
    %14 = vector.shape_cast %13 : vector<64xf32> to vector<1x64xf32>
    %cst_10 = arith.constant 1.562500e-02 : f32
    %15 = vector.broadcast %cst_10 : f32 to vector<1x64xf32>
    %16 = arith.mulf %11, %15 : vector<1x64xf32>
    %cst_11 = arith.constant 1.562500e-02 : f32
    %17 = vector.broadcast %cst_11 : f32 to vector<1x64xf32>
    %18 = arith.mulf %14, %17 : vector<1x64xf32>
    %19 = arith.mulf %16, %16 : vector<1x64xf32>
    %20 = arith.subf %18, %19 : vector<1x64xf32>
    %cst_12 = arith.constant 9.99999974E-6 : f32
    %21 = vector.broadcast %cst_12 : f32 to vector<1x64xf32>
    %22 = arith.addf %20, %21 : vector<1x64xf32>
    %23 = math.rsqrt %22 : vector<1x64xf32>
    %24 = arith.mulf %8, %23 : vector<1x64xf32>
    %25 = arith.mulf %16, %24 : vector<1x64xf32>
    %26 = arith.subf %9, %25 : vector<1x64xf32>
    %27 = vector.broadcast %24 : vector<1x64xf32> to vector<64x64xf32>
    %28 = arith.mulf %7, %27 : vector<64x64xf32>
    %29 = vector.broadcast %26 : vector<1x64xf32> to vector<64x64xf32>
    %30 = arith.addf %28, %29 : vector<64x64xf32>
    %cst_13 = arith.constant 0.000000e+00 : f32
    %31 = vector.broadcast %cst_13 : f32 to vector<64x64xf32>
    %32 = arith.maximumf %30, %31 : vector<64x64xf32>
    %c0_14 = arith.constant 0 : index
    %c0_15 = arith.constant 0 : index
    %33 = vector.load %arg5[%c0_14, %c0_15] : memref<64x128xf32, #tpu.memory_space<vmem>>, vector<64x128xf32>
    %cst_16 = arith.constant dense<0.000000e+00> : vector<64x128xf32>
    %34 = tpu.matmul %32, %33, %cst_16 {dimension_numbers = #tpu.dot_dimension_numbers<[1], [0], [0], [1], [0, 0, 1, 1], [], []>} : vector<64x64xf32>, vector<64x128xf32>, vector<64x128xf32> -> vector<64x128xf32>
    %c0_17 = arith.constant 0 : index
    %c0_18 = arith.constant 0 : index
    %35 = vector.load %arg6[%c0_17, %c0_18] : memref<1x128xf32, #tpu.memory_space<vmem>>, vector<1x128xf32>
    %36 = vector.broadcast %35 : vector<1x128xf32> to vector<64x128xf32>
    %37 = arith.addf %34, %36 : vector<64x128xf32>
    %c0_19 = arith.constant 0 : index
    %c0_20 = arith.constant 0 : index
    %38 = vector.load %arg7[%c0_19, %c0_20] : memref<1x128xf32, #tpu.memory_space<vmem>>, vector<1x128xf32>
    %c0_21 = arith.constant 0 : index
    %c0_22 = arith.constant 0 : index
    %39 = vector.load %arg8[%c0_21, %c0_22] : memref<1x128xf32, #tpu.memory_space<vmem>>, vector<1x128xf32>
    %cst_23 = arith.constant dense<0.000000e+00> : vector<128xf32>
    %40 = vector.multi_reduction <add>, %37, %cst_23 [0] : vector<64x128xf32> to vector<128xf32>
    %41 = vector.shape_cast %40 : vector<128xf32> to vector<1x128xf32>
    %42 = arith.mulf %37, %37 : vector<64x128xf32>
    %cst_24 = arith.constant dense<0.000000e+00> : vector<128xf32>
    %43 = vector.multi_reduction <add>, %42, %cst_24 [0] : vector<64x128xf32> to vector<128xf32>
    %44 = vector.shape_cast %43 : vector<128xf32> to vector<1x128xf32>
    %cst_25 = arith.constant 1.562500e-02 : f32
    %45 = vector.broadcast %cst_25 : f32 to vector<1x128xf32>
    %46 = arith.mulf %41, %45 : vector<1x128xf32>
    %cst_26 = arith.constant 1.562500e-02 : f32
    %47 = vector.broadcast %cst_26 : f32 to vector<1x128xf32>
    %48 = arith.mulf %44, %47 : vector<1x128xf32>
    %49 = arith.mulf %46, %46 : vector<1x128xf32>
    %50 = arith.subf %48, %49 : vector<1x128xf32>
    %cst_27 = arith.constant 9.99999974E-6 : f32
    %51 = vector.broadcast %cst_27 : f32 to vector<1x128xf32>
    %52 = arith.addf %50, %51 : vector<1x128xf32>
    %53 = math.rsqrt %52 : vector<1x128xf32>
    %54 = arith.mulf %38, %53 : vector<1x128xf32>
    %55 = arith.mulf %46, %54 : vector<1x128xf32>
    %56 = arith.subf %39, %55 : vector<1x128xf32>
    %57 = vector.broadcast %54 : vector<1x128xf32> to vector<64x128xf32>
    %58 = arith.mulf %37, %57 : vector<64x128xf32>
    %59 = vector.broadcast %56 : vector<1x128xf32> to vector<64x128xf32>
    %60 = arith.addf %58, %59 : vector<64x128xf32>
    %cst_28 = arith.constant 0.000000e+00 : f32
    %61 = vector.broadcast %cst_28 : f32 to vector<64x128xf32>
    %62 = arith.maximumf %60, %61 : vector<64x128xf32>
    %c0_29 = arith.constant 0 : index
    %c0_30 = arith.constant 0 : index
    %63 = vector.load %arg9[%c0_29, %c0_30] : memref<128x64xf32, #tpu.memory_space<vmem>>, vector<128x64xf32>
    %cst_31 = arith.constant dense<0.000000e+00> : vector<64x64xf32>
    %64 = tpu.matmul %62, %63, %cst_31 {dimension_numbers = #tpu.dot_dimension_numbers<[1], [0], [0], [1], [0, 0, 1, 1], [], []>} : vector<64x128xf32>, vector<128x64xf32>, vector<64x64xf32> -> vector<64x64xf32>
    %c0_32 = arith.constant 0 : index
    %c0_33 = arith.constant 0 : index
    %65 = vector.load %arg10[%c0_32, %c0_33] : memref<1x64xf32, #tpu.memory_space<vmem>>, vector<1x64xf32>
    %66 = vector.broadcast %65 : vector<1x64xf32> to vector<64x64xf32>
    %67 = arith.addf %64, %66 : vector<64x64xf32>
    %c0_34 = arith.constant 0 : index
    %c0_35 = arith.constant 0 : index
    %68 = vector.load %arg11[%c0_34, %c0_35] : memref<1x64xf32, #tpu.memory_space<vmem>>, vector<1x64xf32>
    %c0_36 = arith.constant 0 : index
    %c0_37 = arith.constant 0 : index
    %69 = vector.load %arg12[%c0_36, %c0_37] : memref<1x64xf32, #tpu.memory_space<vmem>>, vector<1x64xf32>
    %cst_38 = arith.constant dense<0.000000e+00> : vector<64xf32>
    %70 = vector.multi_reduction <add>, %67, %cst_38 [0] : vector<64x64xf32> to vector<64xf32>
    %71 = vector.shape_cast %70 : vector<64xf32> to vector<1x64xf32>
    %72 = arith.mulf %67, %67 : vector<64x64xf32>
    %cst_39 = arith.constant dense<0.000000e+00> : vector<64xf32>
    %73 = vector.multi_reduction <add>, %72, %cst_39 [0] : vector<64x64xf32> to vector<64xf32>
    %74 = vector.shape_cast %73 : vector<64xf32> to vector<1x64xf32>
    %cst_40 = arith.constant 1.562500e-02 : f32
    %75 = vector.broadcast %cst_40 : f32 to vector<1x64xf32>
    %76 = arith.mulf %71, %75 : vector<1x64xf32>
    %cst_41 = arith.constant 1.562500e-02 : f32
    %77 = vector.broadcast %cst_41 : f32 to vector<1x64xf32>
    %78 = arith.mulf %74, %77 : vector<1x64xf32>
    %79 = arith.mulf %76, %76 : vector<1x64xf32>
    %80 = arith.subf %78, %79 : vector<1x64xf32>
    %cst_42 = arith.constant 9.99999974E-6 : f32
    %81 = vector.broadcast %cst_42 : f32 to vector<1x64xf32>
    %82 = arith.addf %80, %81 : vector<1x64xf32>
    %83 = math.rsqrt %82 : vector<1x64xf32>
    %84 = arith.mulf %68, %83 : vector<1x64xf32>
    %85 = arith.mulf %76, %84 : vector<1x64xf32>
    %86 = arith.subf %69, %85 : vector<1x64xf32>
    %87 = vector.broadcast %84 : vector<1x64xf32> to vector<64x64xf32>
    %88 = arith.mulf %67, %87 : vector<64x64xf32>
    %89 = vector.broadcast %86 : vector<1x64xf32> to vector<64x64xf32>
    %90 = arith.addf %88, %89 : vector<64x64xf32>
    %cst_43 = arith.constant 0.000000e+00 : f32
    %91 = vector.broadcast %cst_43 : f32 to vector<64x64xf32>
    %92 = arith.maximumf %90, %91 : vector<64x64xf32>
    %c0_44 = arith.constant 0 : index
    %c0_45 = arith.constant 0 : index
    %93 = vector.load %arg13[%c0_44, %c0_45] : memref<64x32xf32, #tpu.memory_space<vmem>>, vector<64x32xf32>
    %cst_46 = arith.constant dense<0.000000e+00> : vector<64x32xf32>
    %94 = tpu.matmul %92, %93, %cst_46 {dimension_numbers = #tpu.dot_dimension_numbers<[1], [0], [0], [1], [0, 0, 1, 1], [], []>} : vector<64x64xf32>, vector<64x32xf32>, vector<64x32xf32> -> vector<64x32xf32>
    %c0_47 = arith.constant 0 : index
    %c0_48 = arith.constant 0 : index
    %95 = vector.load %arg14[%c0_47, %c0_48] : memref<1x32xf32, #tpu.memory_space<vmem>>, vector<1x32xf32>
    %96 = vector.broadcast %95 : vector<1x32xf32> to vector<64x32xf32>
    %97 = arith.addf %94, %96 : vector<64x32xf32>
    %c0_49 = arith.constant 0 : index
    %c0_50 = arith.constant 0 : index
    %98 = vector.load %arg15[%c0_49, %c0_50] : memref<1x32xf32, #tpu.memory_space<vmem>>, vector<1x32xf32>
    %c0_51 = arith.constant 0 : index
    %c0_52 = arith.constant 0 : index
    %99 = vector.load %arg16[%c0_51, %c0_52] : memref<1x32xf32, #tpu.memory_space<vmem>>, vector<1x32xf32>
    %cst_53 = arith.constant dense<0.000000e+00> : vector<32xf32>
    %100 = vector.multi_reduction <add>, %97, %cst_53 [0] : vector<64x32xf32> to vector<32xf32>
    %101 = vector.shape_cast %100 : vector<32xf32> to vector<1x32xf32>
    %102 = arith.mulf %97, %97 : vector<64x32xf32>
    %cst_54 = arith.constant dense<0.000000e+00> : vector<32xf32>
    %103 = vector.multi_reduction <add>, %102, %cst_54 [0] : vector<64x32xf32> to vector<32xf32>
    %104 = vector.shape_cast %103 : vector<32xf32> to vector<1x32xf32>
    %cst_55 = arith.constant 1.562500e-02 : f32
    %105 = vector.broadcast %cst_55 : f32 to vector<1x32xf32>
    %106 = arith.mulf %101, %105 : vector<1x32xf32>
    %cst_56 = arith.constant 1.562500e-02 : f32
    %107 = vector.broadcast %cst_56 : f32 to vector<1x32xf32>
    %108 = arith.mulf %104, %107 : vector<1x32xf32>
    %109 = arith.mulf %106, %106 : vector<1x32xf32>
    %110 = arith.subf %108, %109 : vector<1x32xf32>
    %cst_57 = arith.constant 9.99999974E-6 : f32
    %111 = vector.broadcast %cst_57 : f32 to vector<1x32xf32>
    %112 = arith.addf %110, %111 : vector<1x32xf32>
    %113 = math.rsqrt %112 : vector<1x32xf32>
    %114 = arith.mulf %98, %113 : vector<1x32xf32>
    %115 = arith.mulf %106, %114 : vector<1x32xf32>
    %116 = arith.subf %99, %115 : vector<1x32xf32>
    %117 = vector.broadcast %114 : vector<1x32xf32> to vector<64x32xf32>
    %118 = arith.mulf %97, %117 : vector<64x32xf32>
    %119 = vector.broadcast %116 : vector<1x32xf32> to vector<64x32xf32>
    %120 = arith.addf %118, %119 : vector<64x32xf32>
    %cst_58 = arith.constant 0.000000e+00 : f32
    %121 = vector.broadcast %cst_58 : f32 to vector<64x32xf32>
    %122 = arith.maximumf %120, %121 : vector<64x32xf32>
    %c0_59 = arith.constant 0 : index
    %c0_60 = arith.constant 0 : index
    %123 = vector.load %arg17[%c0_59, %c0_60] : memref<1x32xf32, #tpu.memory_space<vmem>>, vector<1x32xf32>
    %124 = vector.broadcast %123 : vector<1x32xf32> to vector<64x32xf32>
    %125 = arith.mulf %122, %124 : vector<64x32xf32>
    %cst_61 = arith.constant dense<0.000000e+00> : vector<64xf32>
    %126 = vector.multi_reduction <add>, %125, %cst_61 [1] : vector<64x32xf32> to vector<64xf32>
    %127 = vector.shape_cast %126 : vector<64xf32> to vector<64x1xf32>
    %c0_62 = arith.constant 0 : index
    %c0_63 = arith.constant 0 : index
    %128 = vector.load %arg18[%c0_62, %c0_63] : memref<1x1xf32, #tpu.memory_space<vmem>>, vector<1x1xf32>
    %129 = vector.broadcast %128 : vector<1x1xf32> to vector<64x1xf32>
    %130 = arith.addf %127, %129 : vector<64x1xf32>
    %c0_64 = arith.constant 0 : index
    %c0_65 = arith.constant 0 : index
    %131 = vector.load %arg19[%c0_64, %c0_65] : memref<64x1xf32, #tpu.memory_space<vmem>>, vector<64x1xf32>
    tpu.vector_store %arg19[%c0_64, %c0_65], %130 {strides = array<i32>} : memref<64x1xf32, #tpu.memory_space<vmem>>, vector<64x1xf32>,
    return
  }
}

</mosaic_0001>

<bundles_post_ra>
// kernel: tpu_custom_call.1
= control target key start
LH: loop header
LB: loop body
LE: loop exit
PB: predicated region body
PF: predicated region fallthrough
CT: control target
= control target key end

     0   :  { %v1189_v0 = vmov 0   ;;  %vm144_vm0 = vcmask 523264   ;;  %vm836_vm1 = vcmask 261120   ;;  %vm986_vm2 = vcmask 7168   ;;  %s1719_s0 = inlined_call_operand.vmem [shape: f32[64,1], index: 0, kind: input, shape index: {}]   ;;  %s1720_s5 = inlined_call_operand.vmem [shape: f32[64,128], index: 5, kind: input, shape index: {}]   ;;  %s1721_s1 = inlined_call_operand.vmem [shape: f32[1,64], index: 1, kind: input, shape index: {}]   ;;  %s1722_s2 = inlined_call_operand.vmem [shape: f32[1,64], index: 2, kind: input, shape index: {}]   ;;  %s1723_s3 = inlined_call_operand.vmem [shape: f32[1,64], index: 3, kind: input, shape index: {}]   ;;  %s1724_s4 = inlined_call_operand.vmem [shape: f32[1,64], index: 4, kind: input, shape index: {}]   ;;  %s1725_s9 = inlined_call_operand.vmem [shape: f32[128,64], index: 9, kind: input, shape index: {}]   ;;  %s1726_s6 = inlined_call_operand.vmem [shape: f32[1,128], index: 6, kind: input, shape index: {}]   ;;  %s1727_s7 = inlined_call_operand.vmem [shape: f32[1,128], index: 7, kind: input, shape index: {}]   ;;  %s1728_s8 = inlined_call_operand.vmem [shape: f32[1,128], index: 8, kind: input, shape index: {}]   ;;  %s1729_s13 = inlined_call_operand.vmem [shape: f32[64,32], index: 13, kind: input, shape index: {}]   ;;  %s1730_s10 = inlined_call_operand.vmem [shape: f32[1,64], index: 10, kind: input, shape index: {}]   ;;  %s1731_s11 = inlined_call_operand.vmem [shape: f32[1,64], index: 11, kind: input, shape index: {}]   ;;  %s1732_s12 = inlined_call_operand.vmem [shape: f32[1,64], index: 12, kind: input, shape index: {}]   ;;  %s1733_s18 = inlined_call_operand.<no memory space> [shape: f32[1,1], index: 18, kind: input, shape index: {}]   ;;  %s1734_s14 = inlined_call_operand.vmem [shape: f32[1,32], index: 14, kind: input, shape index: {}]   ;;  %s1735_s15 = inlined_call_operand.vmem [shape: f32[1,32], index: 15, kind: input, shape index: {}]   ;;  %s1736_s16 = inlined_call_operand.vmem [shape: f32[1,32], index: 16, kind: input, shape index: {}]   ;;  %s1737_s17 = inlined_call_operand.vmem [shape: f32[1,32], index: 17, kind: input, shape index: {}]   ;;  %s1738_s19 = inlined_call_operand.vmem [shape: f32[64,1], index: 19, kind: output, shape index: {}]  }
   0x1   :  { %1741 = sst [smem:[#allocation3_spill]] %s1719_s0  ;;  %1180 = vset.pattern.permute.xlu1 %v1189_v0  ;;  %1179 = vset.pattern.permute.xlu0 %v1189_v0 }
   0x2   :  { %1742 = sst [smem:[#allocation4_spill]] %s1720_s5 }
   0x3   :  { %1743 = sst [smem:[#allocation5_spill]] %s1721_s1 }
   0x4   :  { %1744 = sst [smem:[#allocation6_spill]] %s1722_s2 }
   0x5   :  { %s1745_s20 = sld [smem:[#allocation3_spill]] }
   0x6   :  { %s1746_s22 = sld [smem:[#allocation4_spill]] }
   0x7   :  { %s1747_s24 = sld [smem:[#allocation5_spill]] }
   0x8   :  { %s1748_s2 = sld [smem:[#allocation6_spill]] }
   0xb   :  { %v66_v1 = vld [vmem:[%s1745_s20 + $0x10] sm:$0xff]  ;;  %v64_v2 = vld [vmem:[%s1745_s20] sm:$0xff]  ;;  %v67_v3 = vld [vmem:[%s1745_s20 + $0x18] sm:$0xff] }
   0xc   :  { %85 = vperm.xlu1 %1180, %v66_v1   ;;  %75 = vperm.xlu0 %1179, %v64_v2   ;;  %v65_v4 = vld [vmem:[%s1745_s20 + $0x8] sm:$0xff]  ;;  %v68_v6 = vld [vmem:[%s1745_s20 + $0x20] sm:$0xff]  ;;  %v71_v7 = vld [vmem:[%s1745_s20 + $0x38] sm:$0xff] }
   0xd   :  { %v69_v5 = vld [vmem:[%s1745_s20 + $0x28] sm:$0xff]  ;;  %v70_v8 = vld [vmem:[%s1745_s20 + $0x30] sm:$0xff]  ;;  %v247_v9 = vld [vmem:[%s1746_s22 + $0x38] sm:$0xff] }
   0xe   :  { %1078 = vmatprep.subr.mxu0 %v247_v9  ;;  %v246_v10 = vld [vmem:[%s1746_s22 + $0x30] sm:$0xff]  ;;  %v245_v11 = vld [vmem:[%s1746_s22 + $0x28] sm:$0xff]  ;;  %v244_v12 = vld [vmem:[%s1746_s22 + $0x20] sm:$0xff] }
   0xf   :  { %1079 = vmatpush3.msra.mxu0 %v247_v9  ;;  %v243_v13 = vld [vmem:[%s1746_s22 + $0x18] sm:$0xff]  ;;  %v242_v14 = vld [vmem:[%s1746_s22 + $0x10] sm:$0xff]  ;;  %v241_v15 = vld [vmem:[%s1746_s22 + $0x8] sm:$0xff] }
  0x10   :  { %90 = vperm.xlu1 %1180, %v67_v3   ;;  %80 = vperm.xlu0 %1179, %v65_v4   ;;  %v240_v16 = vld [vmem:[%s1746_s22] sm:$0xff] }
  0x11   :  { %1080 = vmatprep.subr.mxu0 %v246_v10  ;;  %v999_v17 = vld [vmem:[%s1747_s24] ss:$0 sm:$0xff] }
  0x12   :  { %1081 = vmatpush3.msra.mxu0 %v246_v10  ;;  %v1000_v20 = vld [vmem:[%s1748_s2] ss:$0 sm:$0xff] }
  0x13   :  { %1082 = vmatprep.subr.mxu0 %v245_v11 }
  0x14   :  { %100 = vperm.xlu1 %1180, %v69_v5   ;;  %95 = vperm.xlu0 %1179, %v68_v6  }
  0x15   :  { %1083 = vmatpush3.msra.mxu0 %v245_v11 }
  0x16   :  { %1084 = vmatprep.subr.mxu0 %v244_v12 }
  0x17   :  { %1085 = vmatpush3.msra.mxu0 %v244_v12 }
  0x18   :  { %110 = vperm.xlu1 %1180, %v71_v7   ;;  %105 = vperm.xlu0 %1179, %v70_v8  }
  0x19   :  { %1086 = vmatprep.subr.mxu0 %v243_v13 }
  0x1a   :  { %1087 = vmatpush3.msra.mxu0 %v243_v13 }
  0x1b   :  { %1088 = vmatprep.subr.mxu0 %v242_v14 }
  0x1c   :  { %1089 = vmatpush3.msra.mxu0 %v242_v14 }
  0x1d   :  { %1090 = vmatprep.subr.mxu0 %v241_v15 }
  0x1e   :  { %1091 = vmatpush3.msra.mxu0 %v241_v15 }
  0x1f   :  { %1092 = vmatprep.subr.mxu0 %v240_v16 }
  0x20   :  { %1093 = vmatpush3.msra.mxu0 %v240_v16 }
  0x87   :  { %v86_v18 = vpop.permute.xlu1 %85  ;;  %v76_v19 = vpop.permute.xlu0 %75 }
  0x88   :  { %v121_v21 = vmul.f32 %v999_v17, %v86_v18  ;;  %v119_v22 = vmul.f32 %v999_v17, %v76_v19 }
  0x8a   :  { %v1344_v23 = vadd.f32 %v1000_v20, %v119_v22  ;;  %v1346_v26 = vadd.f32 %v1000_v20, %v121_v21 }
  0x8b   :  { %v91_v24 = vpop.permute.xlu1 %90  ;;  %v81_v25 = vpop.permute.xlu0 %80 }
  0x8c   :  { %v122_v27 = vmul.f32 %v999_v17, %v91_v24  ;;  %v120_v28 = vmul.f32 %v999_v17, %v81_v25  ;;  %v166_v29 = vmul.f32 %v1344_v23, %v1344_v23  ;;  %v168_v34 = vmul.f32 %v1346_v26, %v1346_v26 }
  0x8d   :  { %v145_v37 = vsel %vm144_vm0, %v1344_v23, 0.0  ;;  %v148_v43 = vsel %vm144_vm0, %v1346_v26, 0.0 }
  0x8e   :  { %v1350_v30 = vadd.f32 %v1000_v20, %v122_v27  ;;  %v1352_v31 = vadd.f32 %v1000_v20, %v120_v28  ;;  %v174_v44 = vsel %vm144_vm0, %v166_v29, 0.0  ;;  %v177_v49 = vsel %vm144_vm0, %v168_v34, 0.0 }
  0x8f   :  { %v101_v32 = vpop.permute.xlu1 %100  ;;  %v96_v33 = vpop.permute.xlu0 %95 }
  0x90   :  { %v124_v35 = vmul.f32 %v999_v17, %v101_v32  ;;  %v123_v36 = vmul.f32 %v999_v17, %v96_v33  ;;  %v146_v38 = vsel %vm144_vm0, %v1352_v31, 0.0  ;;  %v167_v39 = vmul.f32 %v1352_v31, %v1352_v31 }
  0x91   :  { %v169_v40 = vmul.f32 %v1350_v30, %v1350_v30  ;;  %v147_v41 = vadd.f32 %v146_v38, %v145_v37  ;;  %v150_v52 = vsel %vm144_vm0, %v1350_v30, 0.0  ;;  %v205_v38 = vlaneseq }
  0x92   :  { %v1364_v42 = vadd.f32 %v1000_v20, %v123_v36  ;;  %v175_v45 = vsel %vm144_vm0, %v167_v39, 0.0  ;;  %v1370_v46 = vadd.f32 %v1000_v20, %v124_v35 }
  0x93   :  { %v111_v47 = vpop.permute.xlu1 %110  ;;  %v106_v48 = vpop.permute.xlu0 %105  ;;  %v149_v50 = vadd.f32 %v148_v43, %v147_v41  ;;  %v176_v51 = vadd.f32 %v175_v45, %v174_v44  ;;  %v179_v56 = vsel %vm144_vm0, %v169_v40, 0.0  ;;  %v206_v39 = vshrl.u32 %v205_v38, 7  ;;  %v142_v40 = vld [vmem:[%s1723_s3] sm:$0x1] }
  0x94   :  { %v170_v53 = vmul.f32 %v1364_v42, %v1364_v42  ;;  %v126_v54 = vmul.f32 %v999_v17, %v111_v47  ;;  %v125_v55 = vmul.f32 %v999_v17, %v106_v48  ;;  %v171_v59 = vmul.f32 %v1370_v46, %v1370_v46  ;;  %v143_v45 = vld [vmem:[%s1724_s4] sm:$0x1] }
  0x95   :  { %v178_v57 = vadd.f32 %v177_v49, %v176_v51  ;;  %v151_v58 = vadd.f32 %v150_v52, %v149_v50  ;;  %v152_v60 = vsel %vm144_vm0, %v1364_v42, 0.0  ;;  %v154_v1 = vsel %vm144_vm0, %v1370_v46, 0.0 }
  0x96   :  { %v1382_v61 = vadd.f32 %v1000_v20, %v126_v54  ;;  %v1384_v62 = vadd.f32 %v1000_v20, %v125_v55  ;;  %v181_v2 = vsel %vm144_vm0, %v170_v53, 0.0  ;;  %v183_v6 = vsel %vm144_vm0, %v171_v59, 0.0 }
  0x97   :  { %v180_v63 = vadd.f32 %v179_v56, %v178_v57  ;;  %v153_v0 = vadd.f32 %v152_v60, %v151_v58  ;;  %v1403_v41 = vsub.s32 0, %v206_v39 }
  0x98   :  { %v172_v3 = vmul.f32 %v1384_v62, %v1384_v62  ;;  %v173_v7 = vmul.f32 %v1382_v61, %v1382_v61  ;;  %v156_v8 = vsel %vm144_vm0, %v1384_v62, 0.0  ;;  %v158_v11 = vsel %vm144_vm0, %v1382_v61, 0.0 }
  0x99   :  { %v182_v4 = vadd.f32 %v181_v2, %v180_v63  ;;  %v155_v5 = vadd.f32 %v154_v1, %v153_v0 }
  0x9a   :  { %v185_v12 = vsel %vm144_vm0, %v172_v3, 0.0  ;;  %v187_v15 = vsel %vm144_vm0, %v173_v7, 0.0  ;;  %v478_v7 = vld [vmem:[%s1725_s9 + $0x68] sm:$0xff] }
  0x9b   :  { %v184_v9 = vadd.f32 %v183_v6, %v182_v4  ;;  %v157_v10 = vadd.f32 %v156_v8, %v155_v5  ;;  %v477_v8 = vld [vmem:[%s1725_s9 + $0x60] sm:$0xff] }
  0x9d   :  { %v159_v13 = vadd.f32 %v158_v11, %v157_v10  ;;  %v186_v14 = vadd.f32 %v185_v12, %v184_v9  ;;  %v476_v9 = vld [vmem:[%s1725_s9 + $0x58] sm:$0xff]  ;;  %v475_v10 = vld [vmem:[%s1725_s9 + $0x50] sm:$0xff]  ;;  %v474_v11 = vld [vmem:[%s1725_s9 + $0x48] sm:$0xff] }
  0x9e   :  { %v473_v12 = vld [vmem:[%s1725_s9 + $0x40] sm:$0xff] }
  0x9f   :  { %v160_v16 = vrot.slane %v159_v13, 4  ;;  %v188_v17 = vadd.f32 %v187_v15, %v186_v14  ;;  %v471_v14 = vld [vmem:[%s1725_s9 + $0x30] sm:$0xff]  ;;  %v470_v15 = vld [vmem:[%s1725_s9 + $0x28] sm:$0xff] }
  0xa1   :  { %v161_v18 = vadd.f32 %v160_v16, %v159_v13  ;;  %v189_v19 = vrot.slane %v188_v17, 4  ;;  %v472_v13 = vld [vmem:[%s1725_s9 + $0x38] sm:$0xff]  ;;  %v469_v16 = vld [vmem:[%s1725_s9 + $0x20] sm:$0xff] }
  0xa3   :  { %v162_v20 = vrot.slane %v161_v18, 2  ;;  %v190_v21 = vadd.f32 %v189_v19, %v188_v17  ;;  %v468_v17 = vld [vmem:[%s1725_s9 + $0x18] sm:$0xff]  ;;  %v466_v19 = vld [vmem:[%s1725_s9 + $0x8] sm:$0xff] }
  0xa5   :  { %v163_v22 = vadd.f32 %v162_v20, %v161_v18  ;;  %v191_v24 = vrot.slane %v190_v21, 2  ;;  %v467_v18 = vld [vmem:[%s1725_s9 + $0x10] sm:$0xff]  ;;  %v465_v20 = vld [vmem:[%s1725_s9] sm:$0xff] }
  0xa7   :  { %v164_v25 = vrot.slane %v163_v22, 1  ;;  %v192_v27 = vadd.f32 %v191_v24, %v190_v21 }
  0xa9   :  { %v165_v28 = vadd.f32 %v164_v25, %v163_v22  ;;  %v193_v29 = vrot.slane %v192_v27, 1  ;;  %v1001_v22 = vld [vmem:[%s1726_s6] ss:$0 sm:$0xff] }
  0xab   :  { %v194_v32 = vadd.f32 %v193_v29, %v192_v27  ;;  %v195_v33 = vmul.f32 0.015625, %v165_v28 }
  0xad   :  { %v196_v34 = vmul.f32 0.015625, %v194_v32  ;;  %v197_v35 = vmul.f32 %v195_v33, %v195_v33 }
  0xaf   :  { %v198_v36 = vsub.f32 %v196_v34, %v197_v35 }
  0xb1   :  { %v199_v37 = vadd.f32 1e-05, %v198_v36 }
  0xb3   :  { %1181 = vrsqrt.f32 %v199_v37 }
  0xc0   :  { %v1182_v43 = vpop.eup %1181 }
  0xc1   :  { %v201_v44 = vmul.f32 %v1182_v43, %v142_v40 }
  0xc3   :  { %v202_v47 = vmul.f32 %v201_v44, %v195_v33  ;;  %v208_v48 = vrot.slane %v201_v44, %v1403_v41 }
  0xc5   :  { %v203_v49 = vsub.f32 %v143_v45, %v202_v47  ;;  %v210_v51 = vmul.f32 %v208_v48, %v1344_v23  ;;  %v211_v52 = vmul.f32 %v208_v48, %v1352_v31  ;;  %v212_v53 = vmul.f32 %v208_v48, %v1346_v26 }
  0xc6   :  { %v213_v57 = vmul.f32 %v208_v48, %v1350_v30  ;;  %v214_v60 = vmul.f32 %v208_v48, %v1364_v42  ;;  %v215_v23 = vmul.f32 %v208_v48, %v1370_v46  ;;  %v216_v26 = vmul.f32 %v208_v48, %v1384_v62  ;;  %v480_v62 = vld [vmem:[%s1725_s9 + $0x78] sm:$0xff] }
  0xc7   :  { %v222_v50 = vrot.slane %v203_v49, %v1403_v41  ;;  %v217_v42 = vmul.f32 %v208_v48, %v1382_v61  ;;  %1106 = vmatprep.subr.mxu1 %v480_v62  ;;  %v479_v61 = vld [vmem:[%s1725_s9 + $0x70] sm:$0xff] }
  0xc8   :  { %1107 = vmatpush3.msra.mxu1 %v480_v62 }
  0xc9   :  { %v224_v54 = vadd.f32 %v222_v50, %v210_v51  ;;  %v225_v55 = vadd.f32 %v222_v50, %v211_v52  ;;  %v226_v56 = vadd.f32 %v222_v50, %v212_v53  ;;  %v227_v63 = vadd.f32 %v222_v50, %v213_v57  ;;  %1108 = vmatprep.subr.mxu1 %v479_v61 }
  0xca   :  { %v228_v1 = vadd.f32 %v222_v50, %v214_v60  ;;  %v229_v2 = vadd.f32 %v222_v50, %v215_v23  ;;  %v230_v3 = vadd.f32 %v222_v50, %v216_v26  ;;  %v231_v5 = vadd.f32 %v222_v50, %v217_v42  ;;  %1109 = vmatpush3.msra.mxu1 %v479_v61 }
  0xcb   :  { %v232_v58 = vmax.f32 %v224_v54, 0.0  ;;  %v233_v59 = vmax.f32 %v225_v55, 0.0  ;;  %v234_v0 = vmax.f32 %v226_v56, 0.0  ;;  %v235_v31 = vmax.f32 %v227_v63, 0.0  ;;  %1110 = vmatprep.subr.mxu1 %v478_v7 }
  0xcc   :  { %v236_v30 = vmax.f32 %v228_v1, 0.0  ;;  %v237_v4 = vmax.f32 %v229_v2, 0.0  ;;  %v238_v6 = vmax.f32 %v230_v3, 0.0  ;;  %v239_v46 = vmax.f32 %v231_v5, 0.0  ;;  %1111 = vmatpush3.msra.mxu1 %v478_v7 }
  0xcd   :  { %1094 = vmatprep.mubr.msk.f32.mxu0 %vm144_vm0, %v232_v58  ;;  %1112 = vmatprep.subr.mxu1 %v477_v8 }
  0xce   :  { %1095 = vmatmul.mubr.msk.f32.vlgmr.msra.gmra.mxu0 %vm144_vm0, %v233_v59  ;;  %1113 = vmatpush3.msra.mxu1 %v477_v8 }
  0xcf   :  { %1097 = vmatprep.mubr.msk.f32.mxu0 %vm144_vm0, %v234_v0  ;;  %1114 = vmatprep.subr.mxu1 %v476_v9 }
  0xd0   :  { %1115 = vmatpush3.msra.mxu1 %v476_v9 }
  0xd1   :  { %1116 = vmatprep.subr.mxu1 %v475_v10 }
  0xd2   :  { %1098 = vmatmul.mubr.msk.f32.gmra.mxu0 %vm144_vm0, %v235_v31  ;;  %1117 = vmatpush3.msra.mxu1 %v475_v10 }
  0xd3   :  { %1100 = vmatprep.mubr.msk.f32.mxu0 %vm144_vm0, %v236_v30  ;;  %1118 = vmatprep.subr.mxu1 %v474_v11 }
  0xd4   :  { %1119 = vmatpush3.msra.mxu1 %v474_v11 }
  0xd5   :  { %1120 = vmatprep.subr.mxu1 %v473_v12 }
  0xd6   :  { %1101 = vmatmul.mubr.msk.f32.gmra.mxu0 %vm144_vm0, %v237_v4  ;;  %1121 = vmatpush3.msra.mxu1 %v473_v12 }
  0xd7   :  { %1103 = vmatprep.mubr.msk.f32.mxu0 %vm144_vm0, %v238_v6  ;;  %1122 = vmatprep.subr.mxu1 %v472_v13 }
  0xd8   :  { %1123 = vmatpush3.msra.mxu1 %v472_v13 }
  0xd9   :  { %1124 = vmatprep.subr.mxu1 %v471_v14 }
  0xda   :  { %1104 = vmatmul.mubr.msk.f32.gmra.mxu0 %vm144_vm0, %v239_v46  ;;  %1125 = vmatpush3.msra.mxu1 %v471_v14  ;;  %v384_v14 = vld [vmem:[%s1727_s7] sm:$0x1] }
  0xdb   :  { %1126 = vmatprep.subr.mxu1 %v470_v15 }
  0xdc   :  { %1127 = vmatpush3.msra.mxu1 %v470_v15 }
  0xdd   :  { %1128 = vmatprep.subr.mxu1 %v469_v16 }
  0xde   :  { %1129 = vmatpush3.msra.mxu1 %v469_v16 }
  0xdf   :  { %1130 = vmatprep.subr.mxu1 %v468_v17 }
  0xe0   :  { %1131 = vmatpush3.msra.mxu1 %v468_v17  ;;  %v385_v17 = vld [vmem:[%s1728_s8] sm:$0x1] }
  0xe1   :  { %1132 = vmatprep.subr.mxu1 %v467_v18 }
  0xe2   :  { %1133 = vmatpush3.msra.mxu1 %v467_v18 }
  0xe3   :  { %1134 = vmatprep.subr.mxu1 %v466_v19 }
  0xe4   :  { %1135 = vmatpush3.msra.mxu1 %v466_v19 }
  0xe5   :  { %1136 = vmatprep.subr.mxu1 %v465_v20 }
  0xe6   :  { %1137 = vmatpush3.msra.mxu1 %v465_v20 }
 0x18e   :  { %v1096_v21 = vpop.f32.mrf.mxu0 }
 0x18f   :  { %v1477_v25 = vadd.f32 %v1096_v21, %v1001_v22 }
 0x190   :  { %v345_v24 = vpop.f32.mrf.mxu0 }
 0x191   :  { %v1479_v27 = vadd.f32 %v1001_v22, %v345_v24  ;;  %v400_v33 = vmul.f32 %v1477_v25, %v1477_v25 }
 0x192   :  { %v1099_v28 = vpop.f32.mrf.mxu0 }
 0x193   :  { %v399_v29 = vmul.f32 %v1479_v27, %v1479_v27  ;;  %v386_v34 = vadd.f32 %v1477_v25, %v1479_v27  ;;  %v1487_v35 = vadd.f32 %v1099_v28, %v1001_v22 }
 0x194   :  { %v355_v32 = vpop.f32.mrf.mxu0 }
 0x195   :  { %v356_v36 = vadd.f32 %v1001_v22, %v355_v32  ;;  %v407_v38 = vadd.f32 %v400_v33, %v399_v29  ;;  %v402_v45 = vmul.f32 %v1487_v35, %v1487_v35 }
 0x196   :  { %v1102_v37 = vpop.f32.mrf.mxu0 }
 0x197   :  { %v387_v39 = vadd.f32 %v386_v34, %v356_v36  ;;  %v401_v40 = vmul.f32 %v356_v36, %v356_v36  ;;  %v1489_v43 = vadd.f32 %v1102_v37, %v1001_v22 }
 0x198   :  { %v365_v44 = vpop.f32.mrf.mxu0 }
 0x199   :  { %v408_v47 = vadd.f32 %v407_v38, %v401_v40  ;;  %v366_v48 = vadd.f32 %v1001_v22, %v365_v44  ;;  %v388_v49 = vadd.f32 %v387_v39, %v1487_v35  ;;  %v404_v54 = vmul.f32 %v1489_v43, %v1489_v43 }
 0x19a   :  { %v1105_v50 = vpop.f32.mrf.mxu0 }
 0x19b   :  { %v389_v51 = vadd.f32 %v388_v49, %v366_v48  ;;  %v403_v52 = vmul.f32 %v366_v48, %v366_v48  ;;  %v409_v53 = vadd.f32 %v408_v47, %v402_v45  ;;  %v381_v57 = vadd.f32 %v1105_v50, %v1001_v22 }
 0x19c   :  { %v375_v55 = vpop.f32.mrf.mxu0 }
 0x19d   :  { %v410_v56 = vadd.f32 %v409_v53, %v403_v52  ;;  %v376_v58 = vadd.f32 %v1001_v22, %v375_v55  ;;  %v390_v59 = vadd.f32 %v389_v51, %v1489_v43  ;;  %v406_v1 = vmul.f32 %v381_v57, %v381_v57  ;;  %v695_v55 = vld [vmem:[%s1729_s13 + $0x28] sm:$0xff] }
 0x19f   :  { %v391_v60 = vadd.f32 %v390_v59, %v376_v58  ;;  %v405_v63 = vmul.f32 %v376_v58, %v376_v58  ;;  %v411_v0 = vadd.f32 %v410_v56, %v404_v54  ;;  %v696_v54 = vld [vmem:[%s1729_s13 + $0x30] sm:$0xff]  ;;  %v694_v56 = vld [vmem:[%s1729_s13 + $0x20] sm:$0xff]  ;;  %v691_v59 = vld [vmem:[%s1729_s13 + $0x8] sm:$0xff] }
 0x1a1   :  { %v392_v23 = vadd.f32 %v391_v60, %v381_v57  ;;  %v412_v26 = vadd.f32 %v411_v0, %v405_v63  ;;  %v690_v60 = vld [vmem:[%s1729_s13] sm:$0xff] }
 0x1a2   :  { %v1010_v63 = vld [vmem:[%s1730_s10] ss:$0 sm:$0xff] }
 0x1a3   :  { %v393_v31 = vrot.slane %v392_v23, 4  ;;  %v413_v2 = vadd.f32 %v412_v26, %v406_v1 }
 0x1a5   :  { %v394_v30 = vadd.f32 %v393_v31, %v392_v23  ;;  %v414_v3 = vrot.slane %v413_v2, 4 }
 0x1a7   :  { %v395_v42 = vrot.slane %v394_v30, 2  ;;  %v415_v4 = vadd.f32 %v414_v3, %v413_v2 }
 0x1a9   :  { %v396_v5 = vadd.f32 %v395_v42, %v394_v30  ;;  %v416_v6 = vrot.slane %v415_v4, 2 }
 0x1ab   :  { %v397_v46 = vrot.slane %v396_v5, 1  ;;  %v417_v62 = vadd.f32 %v416_v6, %v415_v4 }
 0x1ad   :  { %v398_v61 = vadd.f32 %v397_v46, %v396_v5  ;;  %v418_v7 = vrot.slane %v417_v62, 1 }
 0x1af   :  { %v419_v8 = vadd.f32 %v418_v7, %v417_v62  ;;  %v420_v9 = vmul.f32 0.015625, %v398_v61 }
 0x1b1   :  { %v421_v10 = vmul.f32 0.015625, %v419_v8  ;;  %v422_v11 = vmul.f32 %v420_v9, %v420_v9 }
 0x1b3   :  { %v423_v12 = vsub.f32 %v421_v10, %v422_v11 }
 0x1b5   :  { %v424_v13 = vadd.f32 1e-05, %v423_v12 }
 0x1b7   :  { %1183 = vrsqrt.f32 %v424_v13 }
 0x1c4   :  { %v1184_v15 = vpop.eup %1183 }
 0x1c5   :  { %v426_v16 = vmul.f32 %v1184_v15, %v384_v14 }
 0x1c7   :  { %v427_v18 = vmul.f32 %v426_v16, %v420_v9  ;;  %v433_v19 = vrot.slane %v426_v16, %v1403_v41 }
 0x1c9   :  { %v428_v20 = vsub.f32 %v385_v17, %v427_v18  ;;  %v435_v22 = vmul.f32 %v433_v19, %v1479_v27  ;;  %v436_v24 = vmul.f32 %v433_v19, %v1477_v25  ;;  %v437_v28 = vmul.f32 %v433_v19, %v356_v36 }
 0x1ca   :  { %v438_v34 = vmul.f32 %v433_v19, %v1487_v35  ;;  %v439_v39 = vmul.f32 %v433_v19, %v366_v48  ;;  %v440_v47 = vmul.f32 %v433_v19, %v1489_v43  ;;  %v441_v49 = vmul.f32 %v433_v19, %v376_v58  ;;  %v697_v43 = vld [vmem:[%s1729_s13 + $0x38] sm:$0xff]  ;;  %v692_v58 = vld [vmem:[%s1729_s13 + $0x10] sm:$0xff] }
 0x1cb   :  { %v447_v21 = vrot.slane %v428_v20, %v1403_v41  ;;  %v442_v51 = vmul.f32 %v433_v19, %v381_v57  ;;  %1150 = vmatprep.subr.mxu0 %v697_v43  ;;  %v693_v57 = vld [vmem:[%s1729_s13 + $0x18] sm:$0xff] }
 0x1cc   :  { %1151 = vmatpush3.msra.mxu0 %v697_v43 }
 0x1cd   :  { %v449_v29 = vadd.f32 %v447_v21, %v435_v22  ;;  %v450_v32 = vadd.f32 %v447_v21, %v436_v24  ;;  %v451_v33 = vadd.f32 %v447_v21, %v437_v28  ;;  %v452_v40 = vadd.f32 %v447_v21, %v438_v34  ;;  %1152 = vmatprep.subr.mxu0 %v696_v54 }
 0x1ce   :  { %v453_v45 = vadd.f32 %v447_v21, %v439_v39  ;;  %v454_v25 = vadd.f32 %v447_v21, %v440_v47  ;;  %v455_v50 = vadd.f32 %v447_v21, %v441_v49  ;;  %v456_v52 = vadd.f32 %v447_v21, %v442_v51  ;;  %1153 = vmatpush3.msra.mxu0 %v696_v54 }
 0x1cf   :  { %v457_v37 = vmax.f32 %v449_v29, 0.0  ;;  %v458_v38 = vmax.f32 %v450_v32, 0.0  ;;  %v459_v44 = vmax.f32 %v451_v33, 0.0  ;;  %v460_v27 = vmax.f32 %v452_v40, 0.0  ;;  %1154 = vmatprep.subr.mxu0 %v695_v55 }
 0x1d0   :  { %v461_v36 = vmax.f32 %v453_v45, 0.0  ;;  %v462_v35 = vmax.f32 %v454_v25, 0.0  ;;  %v463_v53 = vmax.f32 %v455_v50, 0.0  ;;  %v464_v48 = vmax.f32 %v456_v52, 0.0  ;;  %1155 = vmatpush3.msra.mxu0 %v695_v55 }
 0x1d1   :  { %1138 = vmatprep.mubr.f32.mxu1 %v457_v37  ;;  %1156 = vmatprep.subr.mxu0 %v694_v56 }
 0x1d2   :  { %1139 = vmatmul.mubr.f32.vlgmr.msra.gmra.mxu1 %v458_v38  ;;  %1157 = vmatpush3.msra.mxu0 %v694_v56 }
 0x1d3   :  { %1141 = vmatprep.mubr.f32.mxu1 %v459_v44  ;;  %1158 = vmatprep.subr.mxu0 %v693_v57 }
 0x1d4   :  { %1159 = vmatpush3.msra.mxu0 %v693_v57 }
 0x1d5   :  { %1160 = vmatprep.subr.mxu0 %v692_v58 }
 0x1d6   :  { %1142 = vmatmul.mubr.f32.gmra.mxu1 %v460_v27  ;;  %1161 = vmatpush3.msra.mxu0 %v692_v58 }
 0x1d7   :  { %1144 = vmatprep.mubr.f32.mxu1 %v461_v36  ;;  %1162 = vmatprep.subr.mxu0 %v691_v59 }
 0x1d8   :  { %1163 = vmatpush3.msra.mxu0 %v691_v59 }
 0x1d9   :  { %1164 = vmatprep.subr.mxu0 %v690_v60 }
 0x1da   :  { %1145 = vmatmul.mubr.f32.gmra.mxu1 %v462_v35  ;;  %1165 = vmatpush3.msra.mxu0 %v690_v60 }
 0x1db   :  { %1147 = vmatprep.mubr.f32.mxu1 %v463_v53 }
 0x1de   :  { %1148 = vmatmul.mubr.f32.gmra.mxu1 %v464_v48 }
 0x292   :  { %v1140_v0 = vpop.f32.mrf.mxu1 }
 0x293   :  { %v1536_v1 = vadd.f32 %v1140_v0, %v1010_v63 }
 0x294   :  { %v554_v23 = vpop.f32.mrf.mxu1 }
 0x295   :  { %v1538_v26 = vadd.f32 %v1010_v63, %v554_v23  ;;  %v617_v2 = vmul.f32 %v1536_v1, %v1536_v1  ;;  %v596_v5 = vsel %vm144_vm0, %v1536_v1, 0.0 }
 0x296   :  { %v1143_v31 = vpop.f32.mrf.mxu1 }
 0x297   :  { %v595_v30 = vsel %vm144_vm0, %v1538_v26, 0.0  ;;  %v616_v3 = vmul.f32 %v1538_v26, %v1538_v26  ;;  %v1546_v42 = vadd.f32 %v1143_v31, %v1010_v63  ;;  %v625_v8 = vsel %vm144_vm0, %v617_v2, 0.0 }
 0x298   :  { %v564_v4 = vpop.f32.mrf.mxu1  ;;  %v597_v62 = vadd.f32 %v596_v5, %v595_v30 }
 0x299   :  { %v624_v6 = vsel %vm144_vm0, %v616_v3, 0.0  ;;  %v1551_v46 = vadd.f32 %v1010_v63, %v564_v4  ;;  %v619_v61 = vmul.f32 %v1546_v42, %v1546_v42  ;;  %v600_v15 = vsel %vm144_vm0, %v1546_v42, 0.0 }
 0x29a   :  { %v1146_v7 = vpop.f32.mrf.mxu1  ;;  %v626_v12 = vadd.f32 %v625_v8, %v624_v6  ;;  %v593_v6 = vld [vmem:[%s1731_s11] sm:$0x1] }
 0x29b   :  { %v598_v9 = vsel %vm144_vm0, %v1551_v46, 0.0  ;;  %v618_v10 = vmul.f32 %v1551_v46, %v1551_v46  ;;  %v1560_v11 = vadd.f32 %v1146_v7, %v1010_v63  ;;  %v629_v18 = vsel %vm144_vm0, %v619_v61, 0.0  ;;  %v594_v7 = vld [vmem:[%s1732_s12] sm:$0x1] }
 0x29c   :  { %v599_v13 = vadd.f32 %v598_v9, %v597_v62  ;;  %v574_v14 = vpop.f32.mrf.mxu1 }
 0x29d   :  { %v627_v16 = vsel %vm144_vm0, %v618_v10, 0.0  ;;  %v1565_v17 = vadd.f32 %v1010_v63, %v574_v14  ;;  %v621_v22 = vmul.f32 %v1560_v11, %v1560_v11  ;;  %v604_v37 = vsel %vm144_vm0, %v1560_v11, 0.0 }
 0x29e   :  { %v628_v19 = vadd.f32 %v627_v16, %v626_v12  ;;  %v601_v20 = vadd.f32 %v600_v15, %v599_v13  ;;  %v1149_v21 = vpop.f32.mrf.mxu1 }
 0x29f   :  { %v602_v24 = vsel %vm144_vm0, %v1565_v17, 0.0  ;;  %v620_v28 = vmul.f32 %v1565_v17, %v1565_v17  ;;  %v1574_v29 = vadd.f32 %v1149_v21, %v1010_v63  ;;  %v633_v45 = vsel %vm144_vm0, %v621_v22, 0.0 }
 0x2a0   :  { %v603_v32 = vadd.f32 %v602_v24, %v601_v20  ;;  %v630_v33 = vadd.f32 %v629_v18, %v628_v19  ;;  %v584_v34 = vpop.f32.mrf.mxu1 }
 0x2a1   :  { %v631_v38 = vsel %vm144_vm0, %v620_v28, 0.0  ;;  %v585_v39 = vadd.f32 %v1010_v63, %v584_v34  ;;  %v623_v47 = vmul.f32 %v1574_v29, %v1574_v29  ;;  %v608_v50 = vsel %vm144_vm0, %v1574_v29, 0.0 }
 0x2a2   :  { %v632_v40 = vadd.f32 %v631_v38, %v630_v33  ;;  %v605_v44 = vadd.f32 %v604_v37, %v603_v32 }
 0x2a3   :  { %v606_v49 = vsel %vm144_vm0, %v585_v39, 0.0  ;;  %v622_v27 = vmul.f32 %v585_v39, %v585_v39  ;;  %v637_v53 = vsel %vm144_vm0, %v623_v47, 0.0 }
 0x2a4   :  { %v607_v25 = vadd.f32 %v606_v49, %v605_v44  ;;  %v634_v36 = vadd.f32 %v633_v45, %v632_v40 }
 0x2a5   :  { %v635_v51 = vsel %vm144_vm0, %v622_v27, 0.0 }
 0x2a6   :  { %v609_v35 = vadd.f32 %v608_v50, %v607_v25  ;;  %v636_v52 = vadd.f32 %v635_v51, %v634_v36 }
 0x2a8   :  { %v610_v48 = vrot.slane %v609_v35, 4  ;;  %v638_v43 = vadd.f32 %v637_v53, %v636_v52 }
 0x2aa   :  { %v611_v54 = vadd.f32 %v610_v48, %v609_v35  ;;  %v639_v55 = vrot.slane %v638_v43, 4 }
 0x2ac   :  { %v612_v56 = vrot.slane %v611_v54, 2  ;;  %v640_v57 = vadd.f32 %v639_v55, %v638_v43 }
 0x2ae   :  { %v613_v58 = vadd.f32 %v612_v56, %v611_v54  ;;  %v641_v59 = vrot.slane %v640_v57, 2 }
 0x2b0   :  { %v614_v60 = vrot.slane %v613_v58, 1  ;;  %v642_v63 = vadd.f32 %v641_v59, %v640_v57 }
 0x2b2   :  { %v615_v0 = vadd.f32 %v614_v60, %v613_v58  ;;  %v643_v23 = vrot.slane %v642_v63, 1 }
 0x2b4   :  { %v644_v31 = vadd.f32 %v643_v23, %v642_v63  ;;  %v645_v2 = vmul.f32 0.015625, %v615_v0 }
 0x2b6   :  { %v646_v30 = vmul.f32 0.015625, %v644_v31  ;;  %v647_v3 = vmul.f32 %v645_v2, %v645_v2 }
 0x2b8   :  { %v648_v4 = vsub.f32 %v646_v30, %v647_v3 }
 0x2ba   :  { %v649_v5 = vadd.f32 1e-05, %v648_v4 }
 0x2bc   :  { %1185 = vrsqrt.f32 %v649_v5 }
 0x2c9   :  { %v1186_v62 = vpop.eup %1185 }
 0x2ca   :  { %v651_v61 = vmul.f32 %v1186_v62, %v593_v6 }
 0x2cc   :  { %v652_v8 = vmul.f32 %v651_v61, %v645_v2  ;;  %v658_v9 = vrot.slane %v651_v61, %v1403_v41 }
 0x2ce   :  { %v653_v10 = vsub.f32 %v594_v7, %v652_v8  ;;  %v660_v13 = vmul.f32 %v658_v9, %v1538_v26  ;;  %v661_v14 = vmul.f32 %v658_v9, %v1536_v1  ;;  %v662_v15 = vmul.f32 %v658_v9, %v1551_v46 }
 0x2cf   :  { %v663_v20 = vmul.f32 %v658_v9, %v1546_v42  ;;  %v664_v24 = vmul.f32 %v658_v9, %v1565_v17  ;;  %v665_v1 = vmul.f32 %v658_v9, %v1560_v11  ;;  %v666_v26 = vmul.f32 %v658_v9, %v585_v39 }
 0x2d0   :  { %v672_v12 = vrot.slane %v653_v10, %v1403_v41  ;;  %v667_v17 = vmul.f32 %v658_v9, %v1574_v29  ;;  %v24_v39 = vstv %s1733_s18  ;;  %v1011_v29 = vld [vmem:[%s1734_s14] ss:$0 sm:$0xff] }
 0x2d1   :  { %25 = vst [vmem:[#allocation2] sm:$0x1] %v24_v39 }
 0x2d2   :  { %v674_v16 = vadd.f32 %v672_v12, %v660_v13  ;;  %v675_v18 = vadd.f32 %v672_v12, %v661_v14  ;;  %v676_v19 = vadd.f32 %v672_v12, %v662_v15  ;;  %v677_v28 = vadd.f32 %v672_v12, %v663_v20 }
 0x2d3   :  { %v678_v33 = vadd.f32 %v672_v12, %v664_v24  ;;  %v679_v34 = vadd.f32 %v672_v12, %v665_v1  ;;  %v680_v37 = vadd.f32 %v672_v12, %v666_v26  ;;  %v681_v40 = vadd.f32 %v672_v12, %v667_v17 }
 0x2d4   :  { %v682_v21 = vmax.f32 %v674_v16, 0.0  ;;  %v683_v22 = vmax.f32 %v675_v18, 0.0  ;;  %v684_v32 = vmax.f32 %v676_v19, 0.0  ;;  %v685_v46 = vmax.f32 %v677_v28, 0.0 }
 0x2d5   :  { %v686_v42 = vmax.f32 %v678_v33, 0.0  ;;  %v687_v38 = vmax.f32 %v679_v34, 0.0  ;;  %v688_v44 = vmax.f32 %v680_v37, 0.0  ;;  %v689_v11 = vmax.f32 %v681_v40, 0.0 }
 0x2d6   :  { %1166 = vmatprep.mubr.msk.f32.mxu0 %vm144_vm0, %v682_v21 }
 0x2d7   :  { %1167 = vmatmul.mubr.msk.f32.vlgmr.msra.gmra.mxu0 %vm144_vm0, %v683_v22 }
 0x2d8   :  { %1169 = vmatprep.mubr.msk.f32.mxu0 %vm144_vm0, %v684_v32 }
 0x2db   :  { %1170 = vmatmul.mubr.msk.f32.gmra.mxu0 %vm144_vm0, %v685_v46 }
 0x2dc   :  { %1172 = vmatprep.mubr.msk.f32.mxu0 %vm144_vm0, %v686_v42 }
 0x2df   :  { %1173 = vmatmul.mubr.msk.f32.gmra.mxu0 %vm144_vm0, %v687_v38 }
 0x2e0   :  { %1175 = vmatprep.mubr.msk.f32.mxu0 %vm144_vm0, %v688_v44 }
 0x2e3   :  { %1176 = vmatmul.mubr.msk.f32.gmra.mxu0 %vm144_vm0, %v689_v11 }
 0x397   :  { %v1168_v45 = vpop.f32.mrf.mxu0 }
 0x398   :  { %v1616_v47 = vadd.f32 %v1168_v45, %v1011_v29 }
 0x399   :  { %v795_v49 = vpop.f32.mrf.mxu0 }
 0x39a   :  { %v1618_v27 = vadd.f32 %v1011_v29, %v795_v49  ;;  %v859_v36 = vmul.f32 %v1616_v47, %v1616_v47  ;;  %v838_v53 = vsel %vm836_vm1, %v1616_v47, 0.0 }
 0x39b   :  { %v1171_v25 = vpop.f32.mrf.mxu0 }
 0x39c   :  { %v837_v50 = vsel %vm836_vm1, %v1618_v27, 0.0  ;;  %v858_v51 = vmul.f32 %v1618_v27, %v1618_v27  ;;  %v1626_v35 = vadd.f32 %v1171_v25, %v1011_v29  ;;  %v867_v57 = vsel %vm836_vm1, %v859_v36, 0.0 }
 0x39d   :  { %v805_v52 = vpop.f32.mrf.mxu0  ;;  %v839_v54 = vadd.f32 %v838_v53, %v837_v50 }
 0x39e   :  { %v866_v48 = vsel %vm836_vm1, %v858_v51, 0.0  ;;  %v1631_v43 = vadd.f32 %v1011_v29, %v805_v52  ;;  %v861_v55 = vmul.f32 %v1626_v35, %v1626_v35  ;;  %v842_v31 = vsel %vm836_vm1, %v1626_v35, 0.0 }
 0x39f   :  { %v1174_v56 = vpop.f32.mrf.mxu0  ;;  %v868_v63 = vadd.f32 %v867_v57, %v866_v48  ;;  %v834_v48 = vld [vmem:[%s1735_s15] sm:$0x1] }
 0x3a0   :  { %v840_v58 = vsel %vm836_vm1, %v1631_v43, 0.0  ;;  %v860_v59 = vmul.f32 %v1631_v43, %v1631_v43  ;;  %v1640_v60 = vadd.f32 %v1174_v56, %v1011_v29  ;;  %v871_v3 = vsel %vm836_vm1, %v861_v55, 0.0  ;;  %v835_v56 = vld [vmem:[%s1736_s16] sm:$0x1] }
 0x3a1   :  { %v841_v0 = vadd.f32 %v840_v58, %v839_v54  ;;  %v815_v23 = vpop.f32.mrf.mxu0 }
 0x3a2   :  { %v869_v2 = vsel %vm836_vm1, %v860_v59, 0.0  ;;  %v816_v30 = vadd.f32 %v1011_v29, %v815_v23  ;;  %v863_v62 = vmul.f32 %v1640_v60, %v1640_v60  ;;  %v846_v13 = vsel %vm836_vm1, %v1640_v60, 0.0 }
 0x3a3   :  { %v870_v4 = vadd.f32 %v869_v2, %v868_v63  ;;  %v843_v5 = vadd.f32 %v842_v31, %v841_v0  ;;  %v1177_v6 = vpop.f32.mrf.mxu0 }
 0x3a4   :  { %v844_v61 = vsel %vm836_vm1, %v816_v30, 0.0  ;;  %v862_v7 = vmul.f32 %v816_v30, %v816_v30  ;;  %v1649_v8 = vadd.f32 %v1177_v6, %v1011_v29  ;;  %v875_v19 = vsel %vm836_vm1, %v863_v62, 0.0 }
 0x3a5   :  { %v845_v9 = vadd.f32 %v844_v61, %v843_v5  ;;  %v872_v10 = vadd.f32 %v871_v3, %v870_v4  ;;  %v825_v12 = vpop.f32.mrf.mxu0 }
 0x3a6   :  { %v873_v14 = vsel %vm836_vm1, %v862_v7, 0.0  ;;  %v826_v15 = vadd.f32 %v1011_v29, %v825_v12  ;;  %v865_v20 = vmul.f32 %v1649_v8, %v1649_v8  ;;  %v850_v32 = vsel %vm836_vm1, %v1649_v8, 0.0  ;;  %v1020_v7 = vld [vmem:[%s1737_s17] ss:$0 sm:$0xff] }
 0x3a7   :  { %v874_v16 = vadd.f32 %v873_v14, %v872_v10  ;;  %v847_v18 = vadd.f32 %v846_v13, %v845_v9 }
 0x3a8   :  { %v848_v21 = vsel %vm836_vm1, %v826_v15, 0.0  ;;  %v864_v22 = vmul.f32 %v826_v15, %v826_v15  ;;  %v879_v46 = vsel %vm836_vm1, %v865_v20, 0.0 }
 0x3a9   :  { %v849_v24 = vadd.f32 %v848_v21, %v847_v18  ;;  %v876_v28 = vadd.f32 %v875_v19, %v874_v16 }
 0x3aa   :  { %v877_v33 = vsel %vm836_vm1, %v864_v22, 0.0 }
 0x3ab   :  { %v851_v1 = vadd.f32 %v850_v32, %v849_v24  ;;  %v878_v26 = vadd.f32 %v877_v33, %v876_v28 }
 0x3ad   :  { %v852_v34 = vrot.slane %v851_v1, 4  ;;  %v880_v37 = vadd.f32 %v879_v46, %v878_v26 }
 0x3af   :  { %v853_v42 = vadd.f32 %v852_v34, %v851_v1  ;;  %v881_v17 = vrot.slane %v880_v37, 4 }
 0x3b1   :  { %v854_v38 = vrot.slane %v853_v42, 2  ;;  %v882_v40 = vadd.f32 %v881_v17, %v880_v37  ;;  %v1021_v17 = vld [vmem:[#allocation2] ss:$0 sm:$0xff] }
 0x3b3   :  { %v855_v44 = vadd.f32 %v854_v38, %v853_v42  ;;  %v883_v11 = vrot.slane %v882_v40, 2 }
 0x3b5   :  { %v856_v39 = vrot.slane %v855_v44, 1  ;;  %v884_v29 = vadd.f32 %v883_v11, %v882_v40 }
 0x3b7   :  { %v857_v45 = vadd.f32 %v856_v39, %v855_v44  ;;  %v885_v49 = vrot.slane %v884_v29, 1 }
 0x3b9   :  { %v886_v25 = vadd.f32 %v885_v49, %v884_v29  ;;  %v887_v36 = vmul.f32 0.015625, %v857_v45 }
 0x3bb   :  { %v888_v50 = vmul.f32 0.015625, %v886_v25  ;;  %v889_v51 = vmul.f32 %v887_v36, %v887_v36 }
 0x3bd   :  { %v890_v52 = vsub.f32 %v888_v50, %v889_v51 }
 0x3bf   :  { %v891_v53 = vadd.f32 1e-05, %v890_v52 }
 0x3c1   :  { %1187 = vrsqrt.f32 %v891_v53 }
 0x3ce   :  { %v1188_v54 = vpop.eup %1187 }
 0x3cf   :  { %v893_v55 = vmul.f32 %v1188_v54, %v834_v48 }
 0x3d1   :  { %v894_v57 = vmul.f32 %v893_v55, %v887_v36  ;;  %v900_v58 = vrot.slane %v893_v55, %v1403_v41 }
 0x3d3   :  { %v895_v59 = vsub.f32 %v835_v56, %v894_v57  ;;  %v903_v63 = vmul.f32 %v900_v58, %v1616_v47  ;;  %v902_v23 = vmul.f32 %v900_v58, %v1618_v27  ;;  %v906_v31 = vmul.f32 %v900_v58, %v816_v30 }
 0x3d4   :  { %v904_v2 = vmul.f32 %v900_v58, %v1631_v43  ;;  %v908_v3 = vmul.f32 %v900_v58, %v826_v15  ;;  %v905_v4 = vmul.f32 %v900_v58, %v1626_v35  ;;  %v907_v30 = vmul.f32 %v900_v58, %v1640_v60 }
 0x3d5   :  { %v914_v0 = vrot.slane %v895_v59, %v1403_v41  ;;  %v909_v21 = vmul.f32 %v900_v58, %v1649_v8 }
 0x3d7   :  { %v917_v5 = vadd.f32 %v914_v0, %v903_v63  ;;  %v916_v6 = vadd.f32 %v914_v0, %v902_v23  ;;  %v920_v62 = vadd.f32 %v914_v0, %v906_v31  ;;  %v918_v61 = vadd.f32 %v914_v0, %v904_v2 }
 0x3d8   :  { %v922_v9 = vadd.f32 %v914_v0, %v908_v3  ;;  %v919_v47 = vadd.f32 %v914_v0, %v905_v4  ;;  %v921_v15 = vadd.f32 %v914_v0, %v907_v30  ;;  %v923_v24 = vadd.f32 %v914_v0, %v909_v21 }
 0x3d9   :  { %v925_v10 = vmax.f32 %v917_v5, 0.0  ;;  %v924_v41 = vmax.f32 %v916_v6, 0.0  ;;  %v928_v12 = vmax.f32 %v920_v62, 0.0  ;;  %v926_v27 = vmax.f32 %v918_v61, 0.0 }
 0x3da   :  { %v930_v14 = vmax.f32 %v922_v9, 0.0  ;;  %v927_v35 = vmax.f32 %v919_v47, 0.0  ;;  %v929_v22 = vmax.f32 %v921_v15, 0.0  ;;  %v931_v34 = vmax.f32 %v923_v24, 0.0 }
 0x3db   :  { %v940_v43 = vmul.f32 %v1020_v7, %v925_v10  ;;  %v939_v13 = vmul.f32 %v1020_v7, %v924_v41  ;;  %v943_v19 = vmul.f32 %v1020_v7, %v928_v12  ;;  %v941_v20 = vmul.f32 %v1020_v7, %v926_v27 }
 0x3dc   :  { %v945_v32 = vmul.f32 %v1020_v7, %v930_v14  ;;  %v942_v33 = vmul.f32 %v1020_v7, %v927_v35  ;;  %v944_v46 = vmul.f32 %v1020_v7, %v929_v22  ;;  %v946_v37 = vmul.f32 %v1020_v7, %v931_v34 }
 0x3dd   :  { %v950_v16 = vsel %vm836_vm1, %v940_v43, 0.0  ;;  %v947_v18 = vsel %vm836_vm1, %v939_v13, 0.0  ;;  %v959_v28 = vsel %vm836_vm1, %v943_v19, 0.0  ;;  %v953_v60 = vsel %vm836_vm1, %v941_v20, 0.0 }
 0x3de   :  { %951 = vadd.xlane.f32.xlu1 %v950_v16  ;;  %948 = vadd.xlane.f32.xlu0 %v947_v18  ;;  %v965_v1 = vsel %vm836_vm1, %v945_v32, 0.0  ;;  %v956_v26 = vsel %vm836_vm1, %v942_v33, 0.0  ;;  %v962_v8 = vsel %vm836_vm1, %v944_v46, 0.0  ;;  %v968_v42 = vsel %vm836_vm1, %v946_v37, 0.0 }
 0x3e2   :  { %960 = vadd.xlane.f32.xlu1 %v959_v28  ;;  %954 = vadd.xlane.f32.xlu0 %v953_v60 }
 0x3e6   :  { %966 = vadd.xlane.f32.xlu1 %v965_v1  ;;  %957 = vadd.xlane.f32.xlu0 %v956_v26 }
 0x3ea   :  { %963 = vadd.xlane.f32.xlu0 %v962_v8 }
 0x3ee   :  { %969 = vadd.xlane.f32.xlu0 %v968_v42 }
 0x467   :  { %v952_v38 = vpop.xlane.xlu1 %951  ;;  %v949_v40 = vpop.xlane.xlu0 %948 }
 0x468   :  { %v979_v44 = vadd.f32 %v1021_v17, %v952_v38  ;;  %v978_v11 = vadd.f32 %v1021_v17, %v949_v40 }
 0x46a   :  { %988 = vst.msk [vmem:[%s1738_s19 + $0x8] sm:$0xff] %vm986_vm2, %v979_v44  ;;  %987 = vst.msk [vmem:[%s1738_s19] sm:$0xff] %vm986_vm2, %v978_v11 }
 0x46b   :  { %v961_v39 = vpop.xlane.xlu1 %960  ;;  %v955_v29 = vpop.xlane.xlu0 %954 }
 0x46c   :  { %v982_v45 = vadd.f32 %v1021_v17, %v961_v39  ;;  %v980_v49 = vadd.f32 %v1021_v17, %v955_v29 }
 0x46e   :  { %991 = vst.msk [vmem:[%s1738_s19 + $0x20] sm:$0xff] %vm986_vm2, %v982_v45  ;;  %989 = vst.msk [vmem:[%s1738_s19 + $0x10] sm:$0xff] %vm986_vm2, %v980_v49 }
 0x46f   :  { %v967_v25 = vpop.xlane.xlu1 %966  ;;  %v958_v36 = vpop.xlane.xlu0 %957 }
 0x470   :  { %v984_v50 = vadd.f32 %v1021_v17, %v967_v25  ;;  %v981_v51 = vadd.f32 %v1021_v17, %v958_v36 }
 0x472   :  { %993 = vst.msk [vmem:[%s1738_s19 + $0x30] sm:$0xff] %vm986_vm2, %v984_v50  ;;  %990 = vst.msk [vmem:[%s1738_s19 + $0x18] sm:$0xff] %vm986_vm2, %v981_v51 }
 0x473   :  { %v964_v52 = vpop.xlane.xlu0 %963 }
 0x474   :  { %v983_v53 = vadd.f32 %v1021_v17, %v964_v52 }
 0x476   :  { %992 = vst.msk [vmem:[%s1738_s19 + $0x28] sm:$0xff] %vm986_vm2, %v983_v53 }
 0x477   :  { %v970_v48 = vpop.xlane.xlu0 %969 }
 0x478   :  { %v985_v54 = vadd.f32 %v1021_v17, %v970_v48 }
 0x47a   :  { %994 = vst.msk [vmem:[%s1738_s19 + $0x38] sm:$0xff] %vm986_vm2, %v985_v54 }

</bundles_post_ra>
